<compile_context>
chip_gen: v5e
topology: v5e:2x2
jax: 0.10.0
libtpu: 0.0.40
codegen_flags: <defaults>
</compile_context>

<pallas_src>
import functools

import jax
import jax.numpy as jnp
from jax.experimental import pallas as pl
from jax.experimental.pallas import tpu as pltpu


# ----------------------------- helpers -----------------------------------------

def _round_up(x, m):
    return ((x + m - 1) // m) * m


# ----------------------------- fused Pallas kernel ------------------------------

def _make_fused_kernel(num_layers):
    """Kernel args: adj_tile, x_tile, w_init, (w_l, b_l) * num_layers, out_tile."""

    def kernel(*refs):
        adj_ref, x_ref, w_init_ref = refs[0], refs[1], refs[2]
        o_ref = refs[-1]
        layer_refs = refs[3:-1]

        adj = adj_ref[0]  # (TILE, TILE) bf16 tile-local block-diagonal adjacency

        # init_transform: H = X @ W_init  (bias-free), f32 accumulation on the MXU.
        h = jnp.dot(x_ref[...], w_init_ref[...],
                    preferred_element_type=jnp.float32)

        # Unrolled layer loop: H stays resident in VMEM/vregs across layers.
        for l in range(num_layers):
            w = layer_refs[2 * l][...]       # (d_in_pad, d_out_pad) bf16
            b = layer_refs[2 * l + 1][...]   # (1, d_out_pad) f32 (loaded once per layer)
            hw = jnp.dot(h.astype(jnp.bfloat16), w,
                         preferred_element_type=jnp.float32)
            ah = jnp.dot(adj, hw.astype(jnp.bfloat16),
                         preferred_element_type=jnp.float32)
            h = jnp.maximum(ah + b, 0.0)     # bias + ReLU epilogue in f32

        o_ref[...] = h.astype(o_ref.dtype)   # lane-dense (TILE, out_pad) store

    return kernel


# ------------------------------ wrapper -----------------------------------------

def molecular_gcn_forward(adj_per_graph, node_feats, params):
    """Mirrors MolecularGCN.forward:
       h = init_transform(ndata['h']); h = GCN(g, h); h = h.view(B, -1, output_feats)

    adj_per_graph: (B, n, n) f32 per-graph adjacency (no dense block-diag materialized)
    node_feats:    (B*n, in_feats) f32
    """
    B, n, _ = adj_per_graph.shape
    in_feats = node_feats.shape[1]
    assert node_feats.shape[0] == B * n
    num_layers = len(params["gcn_layers"])
    out_feats = params["gcn_layers"][-1][0].shape[1]

    # Pack graphs so each grid step processes a ~128-row node tile.
    gp = max(1, 128 // n)                 # graphs per tile
    pad_g = (-B) % gp
    if pad_g:
        adj_per_graph = jnp.pad(adj_per_graph, ((0, pad_g), (0, 0), (0, 0)))
        node_feats = jnp.pad(node_feats, ((0, pad_g * n), (0, 0)))
    bp = B + pad_g
    num_tiles = bp // gp
    tile = gp * n

    # Tile-local block-diagonal adjacency: (num_tiles, tile, tile), bf16 (0/1 exact).
    a = adj_per_graph.reshape(num_tiles, gp, n, n)
    eye = jnp.eye(gp, dtype=a.dtype)
    adj_tiles = jnp.einsum("tgij,gh->tgihj", a, eye).reshape(
        num_tiles, tile, tile).astype(jnp.bfloat16)

    x = node_feats.astype(jnp.bfloat16)

    # Zero-pad feature dims to multiples of 128 (lane-dense H and output stores).
    d0 = params["w_init"].shape[1]
    d0_pad = _round_up(d0, 128)
    w_init_p = jnp.zeros((in_feats, d0_pad), jnp.bfloat16)
    w_init_p = w_init_p.at[:, :d0].set(params["w_init"].astype(jnp.bfloat16))

    wbs = []
    prev_pad = d0_pad
    for (w, b) in params["gcn_layers"]:
        d_in, d_out = w.shape
        d_out_pad = _round_up(d_out, 128)
        w_p = jnp.zeros((prev_pad, d_out_pad), jnp.bfloat16)
        w_p = w_p.at[:d_in, :d_out].set(w.astype(jnp.bfloat16))
        b_p = jnp.zeros((1, d_out_pad), jnp.float32)
        b_p = b_p.at[:, :d_out].set(b.astype(jnp.float32))
        wbs += [w_p, b_p]
        prev_pad = d_out_pad
    out_pad = prev_pad

    in_specs = [
        pl.BlockSpec((1, tile, tile), lambda t: (t, 0, 0)),   # per-tile adjacency
        pl.BlockSpec((tile, in_feats), lambda t: (t, 0)),     # node features tile
        pl.BlockSpec(w_init_p.shape, lambda t: (0, 0)),       # init_transform weight
    ]
    for arr in wbs:                                           # per-layer W / b (whole)
        in_specs.append(pl.BlockSpec(arr.shape, lambda t: (0, 0)))
    out_spec = pl.BlockSpec((tile, out_pad), lambda t: (t, 0))

    out = pl.pallas_call(
        _make_fused_kernel(num_layers),
        out_shape=jax.ShapeDtypeStruct((bp * n, out_pad), jnp.float32),
        grid=(num_tiles,),
        in_specs=in_specs,
        out_specs=out_spec,
        compiler_params=pltpu.CompilerParams(
            dimension_semantics=("parallel",)),               # megacore on v7x
    )(adj_tiles, x, w_init_p, *wbs)

    # Strip padding (rows of padded graphs, padded feature lanes) and reshape
    # exactly like node_feats.view(batch_size, -1, output_feats).
    out = out[:B * n, :out_feats]
    return out.reshape(B, n, out_feats)


# --------------------------- deterministic setup --------------------------------

def init_params(key, in_feats, dim_embedding, hidden_feats):
    keys = jax.random.split(key, 1 + 2 * len(hidden_feats))
    # init_transform.weight is (dim_embedding, in_feats) in PyTorch; we store its
    # transpose (in_feats, dim_embedding).  weight[-1].fill_(0) zeroes the last
    # OUTPUT feature -> zero the last column here.
    w_init = 0.1 * jax.random.normal(keys[0], (in_feats, dim_embedding), jnp.float32)
    w_init = w_init.at[:, -1].set(0.0)

    gcn_layers = []
    prev = dim_embedding
    for i, hf in enumerate(hidden_feats):
        w = 0.1 * jax.random.normal(keys[1 + 2 * i], (prev, hf), jnp.float32)
        b = 0.01 * jax.random.normal(keys[2 + 2 * i], (1, hf), jnp.float32)
        gcn_layers.append((w, b))
        prev = hf
    return {"w_init": w_init, "gcn_layers": gcn_layers}


def build_graph_adjacency(batch_size, nodes_per_graph):
    """Per-graph ring adjacency with self-loops: (B, n, n)."""
    idx = jnp.arange(nodes_per_graph)
    diff = jnp.abs(idx[:, None] - idx[None, :])
    ring = (diff == 1) | (diff == nodes_per_graph - 1)
    a = ring.astype(jnp.float32) + jnp.eye(nodes_per_graph, dtype=jnp.float32)
    return jnp.broadcast_to(a, (batch_size, nodes_per_graph, nodes_per_graph))


def _block_diag(adj_per_graph):
    return jax.scipy.linalg.block_diag(
        *[adj_per_graph[i] for i in range(adj_per_graph.shape[0])])


def reference_forward_f32(adj_per_graph, node_feats, params, batch_size, out_feats):
    adj = _block_diag(adj_per_graph)
    h = node_feats @ params["w_init"]
    for (w, b) in params["gcn_layers"]:
        h = jnp.maximum(adj @ (h @ w) + b, 0.0)
    return h.reshape(batch_size, -1, out_feats)


def reference_forward_bf16(adj_per_graph, node_feats, params, batch_size, out_feats):
    """Mirrors the kernel's numerics: bf16 matmul inputs, f32 accumulation."""
    adj = _block_diag(adj_per_graph).astype(jnp.bfloat16)
    h = jnp.dot(node_feats.astype(jnp.bfloat16),
                params["w_init"].astype(jnp.bfloat16),
                preferred_element_type=jnp.float32)
    for (w, b) in params["gcn_layers"]:
        hw = jnp.dot(h.astype(jnp.bfloat16), w.astype(jnp.bfloat16),
                     preferred_element_type=jnp.float32)
        ah = jnp.dot(adj, hw.astype(jnp.bfloat16),
                     preferred_element_type=jnp.float32)
        h = jnp.maximum(ah + b.astype(jnp.float32), 0.0)
    return h.reshape(batch_size, -1, out_feats)


# ---------------------------------- main -----------------------------------------

if __name__ == "__main__":
    in_feats = 16
    dim_embedding = 128
    hidden_feats = [64, 64]          # activation = ReLU per layer
    batch_size = 16
    nodes_per_graph = 16             # 16 graphs x 16 nodes -> two 128-row tiles
    total_nodes = batch_size * nodes_per_graph
    output_feats = hidden_feats[-1]

    key = jax.random.PRNGKey(0)
    k_param, k_x = jax.random.split(key)

    params = init_params(k_param, in_feats, dim_embedding, hidden_feats)
    node_feats = jax.random.normal(k_x, (total_nodes, in_feats), jnp.float32)
    adj_per_graph = build_graph_adjacency(batch_size, nodes_per_graph)

    fwd = jax.jit(functools.partial(molecular_gcn_forward))
    out = fwd(adj_per_graph, node_feats, params)
    out = jax.block_until_ready(out)

    ref_bf16 = reference_forward_bf16(adj_per_graph, node_feats, params,
                                      batch_size, output_feats)
    ref_f32 = reference_forward_f32(adj_per_graph, node_feats, params,
                                    batch_size, output_feats)

    assert out.shape == (batch_size, nodes_per_graph, output_feats), out.shape
    # Tight check against the same bf16-in / f32-accumulate recipe the kernel uses.
    assert jnp.allclose(out, ref_bf16, atol=2e-2, rtol=2e-2), "mismatch vs bf16 reference"
    # Looser sanity check against the full-f32 module math (bf16 MXU inputs).
    assert jnp.allclose(out, ref_f32, atol=1.5e-1, rtol=1e-1), "mismatch vs f32 reference"

    print("KERNEL_OK")
</pallas_src>

<mosaic_0001>
module attributes {stable_mosaic.version = 11 : i64} {
  func.func @kernel(%arg0: i32, %arg1: memref<1x128x128xbf16, #tpu.memory_space<vmem>>, %arg2: memref<128x16xbf16, #tpu.memory_space<vmem>>, %arg3: memref<16x128xbf16, #tpu.memory_space<vmem>>, %arg4: memref<128x128xbf16, #tpu.memory_space<vmem>>, %arg5: memref<1x128xf32, #tpu.memory_space<vmem>>, %arg6: memref<128x128xbf16, #tpu.memory_space<vmem>>, %arg7: memref<1x128xf32, #tpu.memory_space<vmem>>, %arg8: memref<128x128xf32, #tpu.memory_space<vmem>>) attributes {dimension_semantics = [#tpu.dimension_semantics<parallel>], iteration_bounds = array<i64: 2>, scalar_prefetch = 0 : i64, scratch_operands = 0 : i64, tpu.core_type = #tpu.core_type<tc>, window_params = [{transform_indices = @transform_0, window_bounds = array<i64: 1, 128, 128>}, {transform_indices = @transform_1, window_bounds = array<i64: 128, 16>}, {pipeline_mode = #tpu.pipeline_mode<synchronous>, transform_indices = @transform_2, window_bounds = array<i64: 16, 128>}, {pipeline_mode = #tpu.pipeline_mode<synchronous>, transform_indices = @transform_3, window_bounds = array<i64: 128, 128>}, {pipeline_mode = #tpu.pipeline_mode<synchronous>, transform_indices = @transform_4, window_bounds = array<i64: 1, 128>}, {pipeline_mode = #tpu.pipeline_mode<synchronous>, transform_indices = @transform_5, window_bounds = array<i64: 128, 128>}, {pipeline_mode = #tpu.pipeline_mode<synchronous>, transform_indices = @transform_6, window_bounds = array<i64: 1, 128>}, {transform_indices = @transform_7, window_bounds = array<i64: 128, 128>}]} {
    %c0 = arith.constant 0 : index
    %c0_0 = arith.constant 0 : index
    %c0_1 = arith.constant 0 : index
    %0 = vector.load %arg1[%c0, %c0_0, %c0_1] : memref<1x128x128xbf16, #tpu.memory_space<vmem>>, vector<1x128x128xbf16>
    %1 = vector.shape_cast %0 : vector<1x128x128xbf16> to vector<128x128xbf16>
    %c0_2 = arith.constant 0 : index
    %c0_3 = arith.constant 0 : index
    %2 = vector.load %arg2[%c0_2, %c0_3] : memref<128x16xbf16, #tpu.memory_space<vmem>>, vector<128x16xbf16>
    %c0_4 = arith.constant 0 : index
    %c0_5 = arith.constant 0 : index
    %3 = vector.load %arg3[%c0_4, %c0_5] : memref<16x128xbf16, #tpu.memory_space<vmem>>, vector<16x128xbf16>
    %cst = arith.constant dense<0.000000e+00> : vector<128x128xf32>
    %4 = tpu.matmul %2, %3, %cst {dimension_numbers = #tpu.dot_dimension_numbers<[1], [0], [0], [1], [0, 0, 1, 1], [], []>} : vector<128x16xbf16>, vector<16x128xbf16>, vector<128x128xf32> -> vector<128x128xf32>
    %c0_6 = arith.constant 0 : index
    %c0_7 = arith.constant 0 : index
    %5 = vector.load %arg4[%c0_6, %c0_7] : memref<128x128xbf16, #tpu.memory_space<vmem>>, vector<128x128xbf16>
    %c0_8 = arith.constant 0 : index
    %c0_9 = arith.constant 0 : index
    %6 = vector.load %arg5[%c0_8, %c0_9] : memref<1x128xf32, #tpu.memory_space<vmem>>, vector<1x128xf32>
    %7 = arith.truncf %4 : vector<128x128xf32> to vector<128x128xbf16>
    %cst_10 = arith.constant dense<0.000000e+00> : vector<128x128xf32>
    %8 = tpu.matmul %7, %5, %cst_10 {dimension_numbers = #tpu.dot_dimension_numbers<[1], [0], [0], [1], [0, 0, 1, 1], [], []>} : vector<128x128xbf16>, vector<128x128xbf16>, vector<128x128xf32> -> vector<128x128xf32>
    %9 = arith.truncf %8 : vector<128x128xf32> to vector<128x128xbf16>
    %cst_11 = arith.constant dense<0.000000e+00> : vector<128x128xf32>
    %10 = tpu.matmul %1, %9, %cst_11 {dimension_numbers = #tpu.dot_dimension_numbers<[1], [0], [0], [1], [0, 0, 1, 1], [], []>} : vector<128x128xbf16>, vector<128x128xbf16>, vector<128x128xf32> -> vector<128x128xf32>
    %11 = vector.broadcast %6 : vector<1x128xf32> to vector<128x128xf32>
    %12 = arith.addf %10, %11 : vector<128x128xf32>
    %cst_12 = arith.constant 0.000000e+00 : f32
    %13 = vector.broadcast %cst_12 : f32 to vector<128x128xf32>
    %14 = arith.maximumf %12, %13 : vector<128x128xf32>
    %c0_13 = arith.constant 0 : index
    %c0_14 = arith.constant 0 : index
    %15 = vector.load %arg6[%c0_13, %c0_14] : memref<128x128xbf16, #tpu.memory_space<vmem>>, vector<128x128xbf16>
    %c0_15 = arith.constant 0 : index
    %c0_16 = arith.constant 0 : index
    %16 = vector.load %arg7[%c0_15, %c0_16] : memref<1x128xf32, #tpu.memory_space<vmem>>, vector<1x128xf32>
    %17 = arith.truncf %14 : vector<128x128xf32> to vector<128x128xbf16>
    %cst_17 = arith.constant dense<0.000000e+00> : vector<128x128xf32>
    %18 = tpu.matmul %17, %15, %cst_17 {dimension_numbers = #tpu.dot_dimension_numbers<[1], [0], [0], [1], [0, 0, 1, 1], [], []>} : vector<128x128xbf16>, vector<128x128xbf16>, vector<128x128xf32> -> vector<128x128xf32>
    %19 = arith.truncf %18 : vector<128x128xf32> to vector<128x128xbf16>
    %cst_18 = arith.constant dense<0.000000e+00> : vector<128x128xf32>
    %20 = tpu.matmul %1, %19, %cst_18 {dimension_numbers = #tpu.dot_dimension_numbers<[1], [0], [0], [1], [0, 0, 1, 1], [], []>} : vector<128x128xbf16>, vector<128x128xbf16>, vector<128x128xf32> -> vector<128x128xf32>
    %21 = vector.broadcast %16 : vector<1x128xf32> to vector<128x128xf32>
    %22 = arith.addf %20, %21 : vector<128x128xf32>
    %cst_19 = arith.constant 0.000000e+00 : f32
    %23 = vector.broadcast %cst_19 : f32 to vector<128x128xf32>
    %24 = arith.maximumf %22, %23 : vector<128x128xf32>
    %c0_20 = arith.constant 0 : index
    %c0_21 = arith.constant 0 : index
    %25 = vector.load %arg8[%c0_20, %c0_21] : memref<128x128xf32, #tpu.memory_space<vmem>>, vector<128x128xf32>
    tpu.vector_store %arg8[%c0_20, %c0_21], %24 {strides = array<i32>} : memref<128x128xf32, #tpu.memory_space<vmem>>, vector<128x128xf32>,
    return
  }
  func.func @transform_0(%arg0: i32) -> (i32, i32, i32) {
    %c0_i32 = arith.constant 0 : i32
    %c0_i32_0 = arith.constant 0 : i32
    %c0_i32_1 = arith.constant 0 : i32
    return %arg0, %c0_i32, %c0_i32_0 : i32, i32, i32
  }
  func.func @transform_1(%arg0: i32) -> (i32, i32) {
    %c0_i32 = arith.constant 0 : i32
    %c0_i32_0 = arith.constant 0 : i32
    return %arg0, %c0_i32 : i32, i32
  }
  func.func @transform_2(%arg0: i32) -> (i32, i32) {
    %c0_i32 = arith.constant 0 : i32
    %c0_i32_0 = arith.constant 0 : i32
    %c0_i32_1 = arith.constant 0 : i32
    return %c0_i32, %c0_i32_0 : i32, i32
  }
  func.func @transform_3(%arg0: i32) -> (i32, i32) {
    %c0_i32 = arith.constant 0 : i32
    %c0_i32_0 = arith.constant 0 : i32
    %c0_i32_1 = arith.constant 0 : i32
    return %c0_i32, %c0_i32_0 : i32, i32
  }
  func.func @transform_4(%arg0: i32) -> (i32, i32) {
    %c0_i32 = arith.constant 0 : i32
    %c0_i32_0 = arith.constant 0 : i32
    %c0_i32_1 = arith.constant 0 : i32
    return %c0_i32, %c0_i32_0 : i32, i32
  }
  func.func @transform_5(%arg0: i32) -> (i32, i32) {
    %c0_i32 = arith.constant 0 : i32
    %c0_i32_0 = arith.constant 0 : i32
    %c0_i32_1 = arith.constant 0 : i32
    return %c0_i32, %c0_i32_0 : i32, i32
  }
  func.func @transform_6(%arg0: i32) -> (i32, i32) {
    %c0_i32 = arith.constant 0 : i32
    %c0_i32_0 = arith.constant 0 : i32
    %c0_i32_1 = arith.constant 0 : i32
    return %c0_i32, %c0_i32_0 : i32, i32
  }
  func.func @transform_7(%arg0: i32) -> (i32, i32) {
    %c0_i32 = arith.constant 0 : i32
    %c0_i32_0 = arith.constant 0 : i32
    return %arg0, %c0_i32 : i32, i32
  }
}

</mosaic_0001>

<bundles_post_ra>
// kernel: molecular_gcn_forward.1
= control target key start
LH: loop header
LB: loop body
LE: loop exit
PB: predicated region body
PF: predicated region fallthrough
CT: control target
= control target key end

     0   :  { %12 = vsyncpa [#allocation3], 0  ;;  %s1573_s0 = inlined_call_operand.vmem [shape: bf16[2,128,128], index: 0, kind: input, shape index: {}]   ;;  %s1574_s1 = inlined_call_operand.vmem [shape: bf16[256,16], index: 1, kind: input, shape index: {}]   ;;  %s1575_s2 = inlined_call_operand.vmem [shape: bf16[16,128], index: 2, kind: input, shape index: {}]   ;;  %s1576_s3 = inlined_call_operand.vmem [shape: bf16[128,128], index: 3, kind: input, shape index: {}]   ;;  %s1577_s4 = inlined_call_operand.vmem [shape: f32[1,128], index: 4, kind: input, shape index: {}]   ;;  %s1578_s5 = inlined_call_operand.vmem [shape: bf16[128,128], index: 5, kind: input, shape index: {}]   ;;  %s1579_s6 = inlined_call_operand.vmem [shape: f32[1,128], index: 6, kind: input, shape index: {}]   ;;  %s1580_s7 = inlined_call_operand.hbm [shape: f32[256,128], index: 7, kind: output, shape index: {}]  }
   0x1   :  { %14 = vsyncpa [#allocation3 + $0x1], 0  ;;  %s1346_s24 = smov 0   ;;  %s1348_s25 = smov 0  }
   0x2   :  { %s1350_s26 = smov 0   ;;  %s1352_s27 = smov 0  }
   0x3 LB: > { %s1367_s28 = sadd.s32 4294967295, %s1302_s27   ;;  %s1005_s29 = sadd.s32 4294967294, %s1302_s27   ;;  %s1302_s27 = sphi %s1352_s27, %s1586_s27   ;;  %s1298_s26 = sphi %s1350_s26, %s1585_s26   ;;  %s1294_s25 = sphi %s1348_s25, %s1584_s25   ;;  %s1290_s24 = sphi %s1346_s24, %s1583_s24  }
   0x4   : > { %s1371_s30 = sadd.s32 1, %s1302_s27   ;;  %s184_s8 = sadd.s32 1, %s1298_s26 }
   0x5   : > { %s181_s9 = ssub.s32 %s1302_s27, %s1371_s30  ;;  %p194_p0 = scmp.ne.s32.totalorder %s1298_s26, %s1294_s25 }
   0x6   : > { %p182_p1 = scmp.eq.s32.totalorder %s181_s9, 0  ;;  %p195_p2 = scmp.eq.s32.totalorder %s1367_s28, 1 }
   0x7   : > { %p200_p3 = scmp.ne.s32.totalorder %s1294_s25, %s1290_s24  ;;  %p201_p4 = scmp.eq.s32.totalorder %s1005_s29, 1 }
   0x8   : > { %s1382_s10 = scalar_select %p182_p1, %s1298_s26, %s184_s8  }
   0x9   : > { %p1384_p5 = por %p195_p2, %p194_p0  ;;  %p1388_p6 = por %p201_p4, %p200_p3 }
   0xa   : > { %p1008_p7 = scmp.ge.s32.totalorder %s1302_s27, 1  ;;  %p251_p8 = scmp.lt.s32.totalorder %s1302_s27, 3 }
   0xc   : > { %p252_p9 = pnand %p1008_p7, %p251_p8 }
   0xd   : > { %s1012_s15 = sshll.u32 (!%p252_p9), %s1367_s28, 4  ;;  %p288_p11 = scmp.lt.s32.totalorder (!%p252_p9), %s1367_s28, 1 }
   0xe   : > { %255 = sbr.rel (%p252_p9) target bundleno = 1123 (0x463), region = 48  ;;  %p294_p10 = scmp.lt.s32.totalorder (!%p252_p9), %s1012_s15, 31 }
   0xf   : > { %s1260_s20 = scalar_lea.hbm (!%p252_p9), %s1580_s7, 256 }
  0x13   : > { %v1176_v0 = vld [vmem:[%s1575_s2] sm:$0xff]  ;;  %s1588_s15 = smov (!%p294_p10, %s1012_s15), 31  ;;  %vm381_vm0 = vcmask 130048   ;;  %v1184_v5 = vld [vmem:[%s1576_s3 + $0x38] sm:$0xff]  ;;  %v1183_v6 = vld [vmem:[%s1576_s3 + $0x30] sm:$0xff] }
  0x14   : > { %413 = vmatpush.bf16.msra.mxu0 %v1176_v0  ;;  %1194 = vmatpush.bf16.msra.mxu1 %v1176_v0  ;;  %s1013_s16 = sshll.u32 %s1588_s15, 2  ;;  %v1182_v7 = vld [vmem:[%s1576_s3 + $0x28] sm:$0xff]  ;;  %v1181_v8 = vld [vmem:[%s1576_s3 + $0x20] sm:$0xff]  ;;  %v1180_v12 = vld [vmem:[%s1576_s3 + $0x18] sm:$0xff] }
  0x15   : > { %1195 = vmatpush.bf16.msra.mxu2 %v1176_v0  ;;  %1196 = vmatpush.bf16.msra.mxu3 %v1176_v0  ;;  %s297_s19 = scalar_lea.vmem %s1574_s1, %s1013_s16  ;;  %v1179_v14 = vld [vmem:[%s1576_s3 + $0x10] sm:$0xff]  ;;  %v1178_v15 = vld [vmem:[%s1576_s3 + $0x8] sm:$0xff]  ;;  %v1177_v16 = vld [vmem:[%s1576_s3] sm:$0xff] }
  0x16   : > { %v1168_v1 = vld [vmem:[%s297_s19] sm:$0xff]  ;;  %v1170_v2 = vld [vmem:[%s297_s19 + $0x10] sm:$0xff]  ;;  %v1175_v4 = vld [vmem:[%s297_s19 + $0x38] sm:$0xff] }
  0x17   : > { %v1172_v3 = vld [vmem:[%s297_s19 + $0x20] sm:$0xff]  ;;  %1050 = vmatmul.msk.bf16.vlgmr.msra.gmra.mxu0 %vm381_vm0, %v1168_v1  ;;  %1052 = vmatmul.msk.bf16.vlgmr.msra.gmra.mxu1 %vm381_vm0, %v1170_v2  ;;  %v1169_v9 = vld [vmem:[%s297_s19 + $0x8] sm:$0xff]  ;;  %v1171_v10 = vld [vmem:[%s297_s19 + $0x18] sm:$0xff] }
  0x18   : > { %1054 = vmatmul.msk.bf16.vlgmr.msra.gmra.mxu2 %vm381_vm0, %v1172_v3  ;;  %1057 = vmatmul.msk.bf16.vlgmr.msra.gmra.mxu3 %vm381_vm0, %v1175_v4  ;;  %v1173_v11 = vld [vmem:[%s297_s19 + $0x28] sm:$0xff]  ;;  %v1174_v13 = vld [vmem:[%s297_s19 + $0x30] sm:$0xff]  ;;  %s289_s19 = scalar_select %p288_p11, %s1367_s28, 1 }
  0x19   : > { %528 = vmatpush.bf16.msrb.mxu1 %v1184_v5 }
  0x1a   : > { %s1159_s23 = sshll.u32 %s289_s19, 6  ;;  %s1193_s19 = sshll.u32 %s1367_s28, 7 }
  0x1b   : > { %s292_s9 = scalar_lea.vmem %s1573_s0, %s1159_s23  ;;  %s927_s8 = scalar_lea.hbm %s1580_s7, %s1193_s19 }
  0x1c   : > { %v1438_v1 = vld [vmem:[%s292_s9] sm:$0xff]  ;;  %v1441_v2 = vld [vmem:[%s292_s9 + $0x8] sm:$0xff]  ;;  %v1444_v3 = vld [vmem:[%s292_s9 + $0x10] sm:$0xff]  ;;  %s930_s14 = sshll.u32 %s927_s8, 4  ;;  %s931_s14 = int_to_ptr.hbm [resolvable:$true] %s930_s14 }
  0x1d   : > { %529 = vmatpush.bf16.msrb.mxu1 %v1183_v6  ;;  %v1447_v4 = vld [vmem:[%s292_s9 + $0x18] sm:$0xff]  ;;  %v1450_v5 = vld [vmem:[%s292_s9 + $0x20] sm:$0xff]  ;;  %v1453_v6 = vld [vmem:[%s292_s9 + $0x28] sm:$0xff]  ;;  %s1254_s16 = sshra.s32 %s931_s14, 4  ;;  %s1255_s16 = int_to_ptr.hbm [resolvable:$true] %s1254_s16 }
  0x1e   : > { %s1256_s28 = scalar_lea.hbm %s1255_s16, 128  ;;  %p1261_p1 = scmp.lt.s32.totalorder %s1255_s16, %s1580_s7 }
  0x1f   : > { %p1257_p12 = scmp.ne.s32.totalorder %s1255_s16, %s1256_s28  ;;  %p1262_p2 = scmp.lt.s32.totalorder %s1260_s20, %s1256_s28 }
  0x21   : > { %530 = vmatpush.bf16.msrb.mxu1 %v1182_v7  ;;  %v1192_v7 = vld [vmem:[%s1578_s5 + $0x38] sm:$0xff]  ;;  %p1258_p13 = pnand %p1257_p12, %p1384_p5  ;;  %p1263_p3 = por %p1262_p2, %p1261_p1 }
  0x22   : > { %774 = vmatpush.bf16.msrb.mxu3 %v1192_v7 }
  0x23   : > { %p1259_p0 = pneg %p1258_p13 }
  0x25   : > { %531 = vmatpush.bf16.msrb.mxu1 %v1181_v8  ;;  %v1191_v8 = vld [vmem:[%s1578_s5 + $0x30] sm:$0xff]  ;;  %p1264_p4 = pnand %p1263_p3, %p1259_p0 }
  0x26   : > { %775 = vmatpush.bf16.msrb.mxu3 %v1191_v8 }
  0x27   : > { %1051 = vmatmul.msk.bf16.gmra.mxu0 %vm381_vm0, %v1169_v9  ;;  %1053 = vmatmul.msk.bf16.gmra.mxu1 %vm381_vm0, %v1171_v10  ;;  %v1190_v9 = vld [vmem:[%s1578_s5 + $0x28] sm:$0xff]  ;;  %v1189_v10 = vld [vmem:[%s1578_s5 + $0x20] sm:$0xff] }
  0x28   : > { %1055 = vmatmul.msk.bf16.gmra.mxu2 %vm381_vm0, %v1173_v11  ;;  %v1468_v11 = vld [vmem:[%s292_s9 + $0x30] sm:$0xff] }
  0x29   : > { %532 = vmatpush.bf16.msrb.mxu1 %v1180_v12  ;;  %v1188_v12 = vld [vmem:[%s1578_s5 + $0x18] sm:$0xff] }
  0x2a   : > { %776 = vmatpush.bf16.msrb.mxu3 %v1190_v9 }
  0x2d   : > { %533 = vmatpush.bf16.msrb.mxu1 %v1179_v14  ;;  %v1186_v14 = vld [vmem:[%s1578_s5 + $0x8] sm:$0xff] }
  0x2e   : > { %777 = vmatpush.bf16.msrb.mxu3 %v1189_v10 }
  0x31   : > { %534 = vmatpush.bf16.msrb.mxu1 %v1178_v15  ;;  %v1480_v15 = vld [vmem:[%s292_s9 + $0x38] sm:$0xff]  ;;  %s285_s9 = sand.u32 1, %s1294_s25  }
  0x32   : > { %778 = vmatpush.bf16.msrb.mxu3 %v1188_v12  ;;  %s1009_s21 = sshll.u32 %s285_s9, 7  ;;  %s916_s15 = scalar_lea.sflag [#allocation3], %s285_s9 }
  0x33   : > { %s1506_s22 = scalar_lea.vmem [#allocation2], %s1009_s21 }
  0x34   : > { %s928_s13 = sshll.u32 %s1506_s22, 4  ;;  %s929_s13 = int_to_ptr.vmem [resolvable:$true] %s928_s13 }
  0x35   : > { %535 = vmatpush.bf16.msrb.mxu1 %v1177_v16  ;;  %v1185_v16 = vld [vmem:[%s1578_s5] sm:$0xff] }
  0x38   : > { %1056 = vmatmul.msk.bf16.gmra.mxu2 %vm381_vm0, %v1174_v13  ;;  %v1187_v13 = vld [vmem:[%s1578_s5 + $0x10] sm:$0xff] }
  0x39   : > { %779 = vmatpush.bf16.msrb.mxu3 %v1187_v13 }
  0x3d   : > { %780 = vmatpush.bf16.msrb.mxu3 %v1186_v14 }
  0x41   : > { %781 = vmatpush.bf16.msrb.mxu3 %v1185_v16 }
  0x94   : > { %v415_v17 = vpop.f32.mrf.mxu0  ;;  %v425_v22 = vpop.f32.mrf.mxu1 }
  0x9b   : > { %v435_v27 = vpop.f32.mrf.mxu2  ;;  %v450_v38 = vpop.f32.mrf.mxu3 }
  0x9c   : > { %v417_v18 = vpop.f32.mrf.mxu0  ;;  %v427_v24 = vpop.f32.mrf.mxu1 }
  0x9d   : > { %v472_v19 = vpack.c.bf16 %v417_v18, %v415_v17  ;;  %v474_v25 = vpack.c.bf16 %v427_v24, %v425_v22  ;;  %v1238_v18 = vld [vmem:[%s1577_s4] ss:$0 sm:$0xff] }
  0x9f   : > { %536 = vmatmul.bf16.vlgmr.msrb.gmra.mxu1 %v472_v19 }
  0xa3   : > { %v437_v30 = vpop.f32.mrf.mxu2  ;;  %v452_v39 = vpop.f32.mrf.mxu3 }
  0xa4   : > { %v420_v20 = vpop.f32.mrf.mxu0  ;;  %v430_v26 = vpop.f32.mrf.mxu1  ;;  %v476_v32 = vpack.c.bf16 %v437_v30, %v435_v27  ;;  %v479_v40 = vpack.c.bf16 %v452_v39, %v450_v38 }
  0xab   : > { %v440_v31 = vpop.f32.mrf.mxu2 }
  0xac   : > { %v422_v21 = vpop.f32.mrf.mxu0  ;;  %v432_v28 = vpop.f32.mrf.mxu1 }
  0xad   : > { %v473_v23 = vpack.c.bf16 %v422_v21, %v420_v20  ;;  %v475_v29 = vpack.c.bf16 %v432_v28, %v430_v26 }
  0xaf   : > { %541 = vmatmul.bf16.gmra.mxu1 %v473_v23 }
  0xb3   : > { %v442_v33 = vpop.f32.mrf.mxu2 }
  0xb4   : > { %v477_v34 = vpack.c.bf16 %v442_v33, %v440_v31 }
  0xbb   : > { %v445_v35 = vpop.f32.mrf.mxu2 }
  0xbf   : > { %546 = vmatmul.bf16.gmra.mxu1 %v474_v25 }
  0xc3   : > { %v447_v36 = vpop.f32.mrf.mxu2 }
  0xc4   : > { %v478_v37 = vpack.c.bf16 %v447_v36, %v445_v35 }
  0xcf   : > { %551 = vmatmul.bf16.gmra.mxu1 %v475_v29 }
  0xdf   : > { %556 = vmatmul.bf16.gmra.mxu1 %v476_v32 }
  0xef   : > { %561 = vmatmul.bf16.gmra.mxu1 %v477_v34 }
  0xff   : > { %566 = vmatmul.bf16.gmra.mxu1 %v478_v37 }
 0x10f   : > { %571 = vmatmul.bf16.gmra.mxu1 %v479_v40 }
 0x11c   : > { %v537_v41 = vpop.f32.mrf.mxu1 }
 0x124   : > { %v539_v42 = vpop.f32.mrf.mxu1 }
 0x125   : > { %v577_v43 = vpack.c.bf16 %v539_v42, %v537_v41 }
 0x12c   : > { %v542_v44 = vpop.f32.mrf.mxu1 }
 0x134   : > { %v544_v45 = vpop.f32.mrf.mxu1 }
 0x135   : > { %v578_v46 = vpack.c.bf16 %v544_v45, %v542_v44 }
 0x13c   : > { %v547_v47 = vpop.f32.mrf.mxu1 }
 0x144   : > { %v549_v48 = vpop.f32.mrf.mxu1 }
 0x145   : > { %v579_v49 = vpack.c.bf16 %v549_v48, %v547_v47 }
 0x14c   : > { %v552_v50 = vpop.f32.mrf.mxu1 }
 0x154   : > { %v554_v51 = vpop.f32.mrf.mxu1 }
 0x155   : > { %v580_v52 = vpack.c.bf16 %v554_v51, %v552_v50 }
 0x15c   : > { %v557_v53 = vpop.f32.mrf.mxu1 }
 0x164   : > { %v559_v54 = vpop.f32.mrf.mxu1 }
 0x165   : > { %v581_v0 = vpack.c.bf16 %v559_v54, %v557_v53 }
 0x16c   : > { %v562_v55 = vpop.f32.mrf.mxu1 }
 0x174   : > { %v564_v56 = vpop.f32.mrf.mxu1 }
 0x175   : > { %v582_v63 = vpack.c.bf16 %v564_v56, %v562_v55 }
 0x17c   : > { %v567_v57 = vpop.f32.mrf.mxu1 }
 0x184   : > { %v569_v58 = vpop.f32.mrf.mxu1 }
 0x185   : > { %v583_v62 = vpack.c.bf16 %v569_v58, %v567_v57 }
 0x18c   : > { %v572_v59 = vpop.f32.mrf.mxu1 }
 0x194   : > { %v574_v60 = vpop.f32.mrf.mxu1 }
 0x195   : > { %v584_v61 = vpack.c.bf16 %v574_v60, %v572_v59 }
 0x197   : > { %636 = vmatpush.bf16.msrb.mxu2 %v584_v61 }
 0x19b   : > { %637 = vmatpush.bf16.msrb.mxu2 %v583_v62 }
 0x19f   : > { %638 = vmatpush.bf16.msrb.mxu2 %v582_v63 }
 0x1a3   : > { %639 = vmatpush.bf16.msrb.mxu2 %v581_v0 }
 0x1a7   : > { %640 = vmatpush.bf16.msrb.mxu2 %v580_v52 }
 0x1ab   : > { %641 = vmatpush.bf16.msrb.mxu2 %v579_v49 }
 0x1af   : > { %642 = vmatpush.bf16.msrb.mxu2 %v578_v46 }
 0x1b3   : > { %643 = vmatpush.bf16.msrb.mxu2 %v577_v43 }
 0x1b6   : > { %644 = vmatmul.bf16.vlgmr.msrb.gmra.mxu2 %v1438_v1 }
 0x1c6   : > { %649 = vmatmul.bf16.gmra.mxu2 %v1441_v2 }
 0x1d6   : > { %654 = vmatmul.bf16.gmra.mxu2 %v1444_v3 }
 0x1e6   : > { %659 = vmatmul.bf16.gmra.mxu2 %v1447_v4 }
 0x1f6   : > { %664 = vmatmul.bf16.gmra.mxu2 %v1450_v5 }
 0x206   : > { %669 = vmatmul.bf16.gmra.mxu2 %v1453_v6 }
 0x216   : > { %674 = vmatmul.bf16.gmra.mxu2 %v1468_v11 }
 0x226   : > { %679 = vmatmul.bf16.gmra.mxu2 %v1480_v15 }
 0x239   : > { %v645_v17 = vpop.f32.mrf.mxu2 }
 0x23a   : > { %v646_v19 = vadd.f32 %v1238_v18, %v645_v17 }
 0x23c   : > { %v685_v22 = vmax.f32 %v646_v19, 0.0 }
 0x241   : > { %v647_v20 = vpop.f32.mrf.mxu2 }
 0x242   : > { %v648_v21 = vadd.f32 %v1238_v18, %v647_v20 }
 0x244   : > { %v686_v23 = vmax.f32 %v648_v21, 0.0 }
 0x246   : > { %v718_v24 = vpack.c.bf16 %v686_v23, %v685_v22 }
 0x248   : > { %782 = vmatmul.bf16.vlgmr.msrb.gmra.mxu3 %v718_v24 }
 0x249   : > { %v650_v25 = vpop.f32.mrf.mxu2 }
 0x24a   : > { %v651_v26 = vadd.f32 %v1238_v18, %v650_v25 }
 0x24c   : > { %v687_v29 = vmax.f32 %v651_v26, 0.0 }
 0x251   : > { %v652_v27 = vpop.f32.mrf.mxu2 }
 0x252   : > { %v653_v28 = vadd.f32 %v1238_v18, %v652_v27 }
 0x254   : > { %v688_v30 = vmax.f32 %v653_v28, 0.0 }
 0x256   : > { %v719_v31 = vpack.c.bf16 %v688_v30, %v687_v29 }
 0x258   : > { %787 = vmatmul.bf16.gmra.mxu3 %v719_v31 }
 0x259   : > { %v655_v32 = vpop.f32.mrf.mxu2 }
 0x25a   : > { %v656_v33 = vadd.f32 %v1238_v18, %v655_v32 }
 0x25c   : > { %v689_v36 = vmax.f32 %v656_v33, 0.0 }
 0x261   : > { %v657_v34 = vpop.f32.mrf.mxu2 }
 0x262   : > { %v658_v35 = vadd.f32 %v1238_v18, %v657_v34 }
 0x264   : > { %v690_v37 = vmax.f32 %v658_v35, 0.0 }
 0x266   : > { %v720_v38 = vpack.c.bf16 %v690_v37, %v689_v36 }
 0x268   : > { %792 = vmatmul.bf16.gmra.mxu3 %v720_v38 }
 0x269   : > { %v660_v39 = vpop.f32.mrf.mxu2 }
 0x26a   : > { %v661_v40 = vadd.f32 %v1238_v18, %v660_v39 }
 0x26c   : > { %v691_v43 = vmax.f32 %v661_v40, 0.0 }
 0x271   : > { %v662_v41 = vpop.f32.mrf.mxu2 }
 0x272   : > { %v663_v42 = vadd.f32 %v1238_v18, %v662_v41 }
 0x274   : > { %v692_v44 = vmax.f32 %v663_v42, 0.0  ;;  %v1501_v42 = vld [vmem:[%s1579_s6] ss:$0 sm:$0xff] }
 0x276   : > { %v721_v45 = vpack.c.bf16 %v692_v44, %v691_v43 }
 0x278   : > { %797 = vmatmul.bf16.gmra.mxu3 %v721_v45 }
 0x279   : > { %v665_v46 = vpop.f32.mrf.mxu2 }
 0x27a   : > { %v666_v47 = vadd.f32 %v1238_v18, %v665_v46 }
 0x27c   : > { %v693_v50 = vmax.f32 %v666_v47, 0.0 }
 0x281   : > { %v667_v48 = vpop.f32.mrf.mxu2 }
 0x282   : > { %v668_v49 = vadd.f32 %v1238_v18, %v667_v48 }
 0x284   : > { %v694_v51 = vmax.f32 %v668_v49, 0.0 }
 0x286   : > { %v722_v52 = vpack.c.bf16 %v694_v51, %v693_v50 }
 0x288   : > { %802 = vmatmul.bf16.gmra.mxu3 %v722_v52 }
 0x289   : > { %v670_v53 = vpop.f32.mrf.mxu2 }
 0x28a   : > { %v671_v54 = vadd.f32 %v1238_v18, %v670_v53 }
 0x28c   : > { %v695_v57 = vmax.f32 %v671_v54, 0.0 }
 0x291   : > { %v672_v55 = vpop.f32.mrf.mxu2 }
 0x292   : > { %v673_v56 = vadd.f32 %v1238_v18, %v672_v55 }
 0x294   : > { %v696_v58 = vmax.f32 %v673_v56, 0.0 }
 0x296   : > { %v723_v59 = vpack.c.bf16 %v696_v58, %v695_v57 }
 0x298   : > { %807 = vmatmul.bf16.gmra.mxu3 %v723_v59 }
 0x299   : > { %v675_v60 = vpop.f32.mrf.mxu2 }
 0x29a   : > { %v676_v61 = vadd.f32 %v1238_v18, %v675_v60 }
 0x29c   : > { %v697_v0 = vmax.f32 %v676_v61, 0.0 }
 0x2a1   : > { %v677_v62 = vpop.f32.mrf.mxu2 }
 0x2a2   : > { %v678_v63 = vadd.f32 %v1238_v18, %v677_v62 }
 0x2a4   : > { %v698_v7 = vmax.f32 %v678_v63, 0.0 }
 0x2a6   : > { %v724_v8 = vpack.c.bf16 %v698_v7, %v697_v0 }
 0x2a8   : > { %812 = vmatmul.bf16.gmra.mxu3 %v724_v8 }
 0x2a9   : > { %v680_v9 = vpop.f32.mrf.mxu2 }
 0x2aa   : > { %v681_v10 = vadd.f32 %v1238_v18, %v680_v9 }
 0x2ac   : > { %v699_v14 = vmax.f32 %v681_v10, 0.0 }
 0x2b1   : > { %v682_v12 = vpop.f32.mrf.mxu2 }
 0x2b2   : > { %v683_v13 = vadd.f32 %v1238_v18, %v682_v12 }
 0x2b4   : > { %v700_v16 = vmax.f32 %v683_v13, 0.0 }
 0x2b6   : > { %v725_v17 = vpack.c.bf16 %v700_v16, %v699_v14 }
 0x2b8   : > { %817 = vmatmul.bf16.gmra.mxu3 %v725_v17 }
 0x2cb   : > { %v783_v19 = vpop.f32.mrf.mxu3 }
 0x2d3   : > { %v785_v20 = vpop.f32.mrf.mxu3 }
 0x2d4   : > { %v823_v21 = vpack.c.bf16 %v785_v20, %v783_v19 }
 0x2db   : > { %v788_v22 = vpop.f32.mrf.mxu3 }
 0x2e3   : > { %v790_v23 = vpop.f32.mrf.mxu3 }
 0x2e4   : > { %v824_v24 = vpack.c.bf16 %v790_v23, %v788_v22 }
 0x2eb   : > { %v793_v25 = vpop.f32.mrf.mxu3 }
 0x2f3   : > { %v795_v26 = vpop.f32.mrf.mxu3 }
 0x2f4   : > { %v825_v27 = vpack.c.bf16 %v795_v26, %v793_v25 }
 0x2fb   : > { %v798_v28 = vpop.f32.mrf.mxu3 }
 0x303   : > { %v800_v29 = vpop.f32.mrf.mxu3 }
 0x304   : > { %v826_v30 = vpack.c.bf16 %v800_v29, %v798_v28 }
 0x30b   : > { %v803_v31 = vpop.f32.mrf.mxu3 }
 0x313   : > { %v805_v32 = vpop.f32.mrf.mxu3 }
 0x314   : > { %v827_v41 = vpack.c.bf16 %v805_v32, %v803_v31 }
 0x31b   : > { %v808_v33 = vpop.f32.mrf.mxu3 }
 0x323   : > { %v810_v18 = vpop.f32.mrf.mxu3 }
 0x324   : > { %v828_v40 = vpack.c.bf16 %v810_v18, %v808_v33 }
 0x32b   : > { %v813_v34 = vpop.f32.mrf.mxu3 }
 0x333   : > { %v815_v35 = vpop.f32.mrf.mxu3 }
 0x334   : > { %v829_v39 = vpack.c.bf16 %v815_v35, %v813_v34 }
 0x33b   : > { %v818_v36 = vpop.f32.mrf.mxu3 }
 0x343   : > { %v820_v37 = vpop.f32.mrf.mxu3 }
 0x344   : > { %v830_v38 = vpack.c.bf16 %v820_v37, %v818_v36 }
 0x346   : > { %834 = vmatpush.bf16.msrb.mxu0 %v830_v38 }
 0x34a   : > { %835 = vmatpush.bf16.msrb.mxu0 %v829_v39 }
 0x34e   : > { %836 = vmatpush.bf16.msrb.mxu0 %v828_v40 }
 0x352   : > { %837 = vmatpush.bf16.msrb.mxu0 %v827_v41 }
 0x356   : > { %838 = vmatpush.bf16.msrb.mxu0 %v826_v30 }
 0x35a   : > { %839 = vmatpush.bf16.msrb.mxu0 %v825_v27 }
 0x35e   : > { %840 = vmatpush.bf16.msrb.mxu0 %v824_v24 }
 0x362   : > { %841 = vmatpush.bf16.msrb.mxu0 %v823_v21 }
 0x365   : > { %842 = vmatmul.bf16.vlgmr.msrb.gmra.mxu0 %v1438_v1 }
 0x375   : > { %847 = vmatmul.bf16.gmra.mxu0 %v1441_v2 }
 0x385   : > { %852 = vmatmul.bf16.gmra.mxu0 %v1444_v3 }
 0x395   : > { %857 = vmatmul.bf16.gmra.mxu0 %v1447_v4 }
 0x3a5   : > { %862 = vmatmul.bf16.gmra.mxu0 %v1450_v5 }
 0x3b5   : > { %867 = vmatmul.bf16.gmra.mxu0 %v1453_v6 }
 0x3c5   : > { %872 = vmatmul.bf16.gmra.mxu0 %v1468_v11 }
 0x3d5   : > { %877 = vmatmul.bf16.gmra.mxu0 %v1480_v15 }
 0x3e2   : > { %v843_v1 = vpop.f32.mrf.mxu0 }
 0x3e3   : > { %v844_v2 = vadd.f32 %v1501_v42, %v843_v1 }
 0x3e5   : > { %v883_v3 = vmax.f32 %v844_v2, 0.0 }
 0x3e7   : > { %899 = vst [vmem:[%s1506_s22] sm:$0xff] %v883_v3 }
 0x3ea   : > { %v845_v4 = vpop.f32.mrf.mxu0 }
 0x3eb   : > { %v846_v5 = vadd.f32 %v1501_v42, %v845_v4 }
 0x3ed   : > { %v884_v6 = vmax.f32 %v846_v5, 0.0 }
 0x3ef   : > { %900 = vst [vmem:[%s1506_s22 + $0x8] sm:$0xff] %v884_v6 }
 0x3f2   : > { %v848_v11 = vpop.f32.mrf.mxu0 }
 0x3f3   : > { %v849_v15 = vadd.f32 %v1501_v42, %v848_v11 }
 0x3f5   : > { %v885_v43 = vmax.f32 %v849_v15, 0.0 }
 0x3f7   : > { %901 = vst [vmem:[%s1506_s22 + $0x10] sm:$0xff] %v885_v43 }
 0x3fa   : > { %v850_v44 = vpop.f32.mrf.mxu0 }
 0x3fb   : > { %v851_v45 = vadd.f32 %v1501_v42, %v850_v44 }
 0x3fd   : > { %v886_v46 = vmax.f32 %v851_v45, 0.0 }
 0x3ff   : > { %902 = vst [vmem:[%s1506_s22 + $0x18] sm:$0xff] %v886_v46 }
 0x402   : > { %v853_v47 = vpop.f32.mrf.mxu0 }
 0x403   : > { %v854_v48 = vadd.f32 %v1501_v42, %v853_v47 }
 0x405   : > { %v887_v49 = vmax.f32 %v854_v48, 0.0 }
 0x407   : > { %903 = vst [vmem:[%s1506_s22 + $0x20] sm:$0xff] %v887_v49 }
 0x40a   : > { %v855_v50 = vpop.f32.mrf.mxu0 }
 0x40b   : > { %v856_v51 = vadd.f32 %v1501_v42, %v855_v50 }
 0x40d   : > { %v888_v52 = vmax.f32 %v856_v51, 0.0 }
 0x40f   : > { %904 = vst [vmem:[%s1506_s22 + $0x28] sm:$0xff] %v888_v52 }
 0x412   : > { %v858_v53 = vpop.f32.mrf.mxu0 }
 0x413   : > { %v859_v54 = vadd.f32 %v1501_v42, %v858_v53 }
 0x415   : > { %v889_v55 = vmax.f32 %v859_v54, 0.0 }
 0x417   : > { %905 = vst [vmem:[%s1506_s22 + $0x30] sm:$0xff] %v889_v55 }
 0x41a   : > { %v860_v56 = vpop.f32.mrf.mxu0 }
 0x41b   : > { %v861_v57 = vadd.f32 %v1501_v42, %v860_v56 }
 0x41d   : > { %v890_v58 = vmax.f32 %v861_v57, 0.0 }
 0x41f   : > { %906 = vst [vmem:[%s1506_s22 + $0x38] sm:$0xff] %v890_v58 }
 0x422   : > { %v863_v59 = vpop.f32.mrf.mxu0 }
 0x423   : > { %v864_v60 = vadd.f32 %v1501_v42, %v863_v59 }
 0x425   : > { %v891_v61 = vmax.f32 %v864_v60, 0.0 }
 0x427   : > { %907 = vst [vmem:[%s1506_s22 + $0x40] sm:$0xff] %v891_v61 }
 0x42a   : > { %v865_v62 = vpop.f32.mrf.mxu0 }
 0x42b   : > { %v866_v63 = vadd.f32 %v1501_v42, %v865_v62 }
 0x42d   : > { %v892_v0 = vmax.f32 %v866_v63, 0.0 }
 0x42f   : > { %908 = vst [vmem:[%s1506_s22 + $0x48] sm:$0xff] %v892_v0 }
 0x432   : > { %v868_v7 = vpop.f32.mrf.mxu0 }
 0x433   : > { %v869_v8 = vadd.f32 %v1501_v42, %v868_v7 }
 0x435   : > { %v893_v9 = vmax.f32 %v869_v8, 0.0 }
 0x437   : > { %909 = vst [vmem:[%s1506_s22 + $0x50] sm:$0xff] %v893_v9 }
 0x43a   : > { %v870_v10 = vpop.f32.mrf.mxu0 }
 0x43b   : > { %v871_v12 = vadd.f32 %v1501_v42, %v870_v10 }
 0x43d   : > { %v894_v13 = vmax.f32 %v871_v12, 0.0 }
 0x43f   : > { %910 = vst [vmem:[%s1506_s22 + $0x58] sm:$0xff] %v894_v13 }
 0x442   : > { %v873_v14 = vpop.f32.mrf.mxu0 }
 0x443   : > { %v874_v16 = vadd.f32 %v1501_v42, %v873_v14 }
 0x445   : > { %v895_v17 = vmax.f32 %v874_v16, 0.0 }
 0x447   : > { %911 = vst [vmem:[%s1506_s22 + $0x60] sm:$0xff] %v895_v17 }
 0x44a   : > { %v875_v19 = vpop.f32.mrf.mxu0 }
 0x44b   : > { %v876_v20 = vadd.f32 %v1501_v42, %v875_v19 }
 0x44d   : > { %v896_v21 = vmax.f32 %v876_v20, 0.0 }
 0x44f   : > { %912 = vst [vmem:[%s1506_s22 + $0x68] sm:$0xff] %v896_v21 }
 0x452   : > { %v878_v22 = vpop.f32.mrf.mxu0 }
 0x453   : > { %v879_v23 = vadd.f32 %v1501_v42, %v878_v22 }
 0x455   : > { %v897_v24 = vmax.f32 %v879_v23, 0.0 }
 0x457   : > { %913 = vst [vmem:[%s1506_s22 + $0x70] sm:$0xff] %v897_v24 }
 0x45a   : > { %v880_v25 = vpop.f32.mrf.mxu0 }
 0x45b   : > { %v881_v26 = vadd.f32 %v1501_v42, %v880_v25 }
 0x45d   : > { %v898_v27 = vmax.f32 %v881_v26, 0.0 }
 0x45f   : > { %914 = vst [vmem:[%s1506_s22 + $0x78] sm:$0xff] %v898_v27 }
 0x460   : > { %1267 = shalt.err (!%p1264_p4)
}
 0x461   : > { %s1304_s9 = smov 128   ;;  %s1305_s22 = smov 8  }
 0x462   : > { %1197 = dma.vmem_to_hbm [thread:$0]  (%p1384_p5), %s929_s13, 2048, %s931_s14, %s916_s15, %s1304_s9, %s1304_s9, %s1305_s22  }
 0x463 PF: > { %p1203_p7 = scmp.ge.s32.totalorder %s1302_s27, 2  ;;  %s945_s23 = sand.u32 1, %s1290_s24  }
 0x464   : > { %s946_s29 = scalar_lea.sflag [#allocation3], %s945_s23 }
 0x465   : > { %p1200_p8 = pnand %p1203_p7, %p1388_p6 }
 0x467   : > { %p1201_p9 = pneg %p1200_p8 }
 0x469   : > { %1285 = dma.done.wait (%p1201_p9), %s946_s29, 2048  }
 0x46a   : > { %1287 = vsyncadd (%p1201_p9), %s946_s29, 4294965248  ;;  %p17_p10 = scmp.ge.s32.totalorder %s1371_s30, 4   ;;  %s1583_s24 = smov %s1294_s25 }
 0x46b   : > { %s1584_s25 = smov %s1298_s26  ;;  %s1585_s26 = smov %s1382_s10 }
 0x46c   : > { %s1586_s27 = smov %s1371_s30  ;;  %19 = sbr.rel (!%p17_p10) target bundleno = 3 (0x3), region = 86 }
 0x471   :  { %952 = vsyncpa [#allocation3], 1 }
 0x472   :  { %954 = vsyncpa [#allocation3 + $0x1], 1 }

</bundles_post_ra>
